<compile_context>
chip_gen: v6e
topology: v6e:2x2x1
jax: 0.10.0
libtpu: 0.0.40
codegen_flags: <defaults>
</compile_context>

<pallas_src>
import functools

import jax
import jax.numpy as jnp
from jax import lax
from jax.experimental import pallas as pl
from jax.experimental.pallas import tpu as pltpu


def _round_up(x, m):
    return (x + m - 1) // m * m


def _default_vmem_limit():
    """~75% of per-core VMEM (48 MiB on v7x, 96 MiB on v5e/v6e); safe fallback."""
    try:
        info = pltpu.get_tpu_info()
        cap = getattr(info, "vmem_capacity_bytes", None)
        if cap:
            return int(cap) * 3 // 4
    except Exception:
        pass
    return 48 * 1024 * 1024


def _vmem_footprint(tm_c, tf_c, n_f_tiles, e_pad, x_item, out_item, mm_item):
    """Rough VMEM bytes: pipelined buffers + hidden (tm, tf) intermediates."""
    dbuf = 2                                                   # Pallas double-buffers
    w = dbuf * e_pad * tf_c * mm_item * 2                      # W1 + W2 chunks
    xo = dbuf * tm_c * e_pad * (x_item + out_item)             # x block + out block
    vecs = dbuf * 4 * (tf_c + 3 * e_pad)                       # b1 chunk, b2, gamma, beta
    h = tm_c * tf_c * (4 + mm_item)                            # f32 h + downcast copy
    acc = tm_c * e_pad * 4 if n_f_tiles > 1 else 0             # accumulator scratch
    ln_tmp = 2 * tm_c * e_pad * 4                              # finalize temporaries
    return w + xo + vecs + h + acc + ln_tmp


def _layer_norm(y, gamma, beta, e_real, eps):
    """One-pass LayerNorm over the last axis.  Padded lanes of y must be zero;
    padded gamma/beta are zero, so padded output lanes come out zero."""
    inv_n = 1.0 / float(e_real)
    s1 = jnp.sum(y, axis=-1, keepdims=True)
    s2 = jnp.sum(y * y, axis=-1, keepdims=True)
    mean = s1 * inv_n
    var = jnp.maximum(s2 * inv_n - mean * mean, 0.0)
    inv = lax.rsqrt(var + eps)
    return (y - mean) * inv * gamma + beta


def _ffn_kernel_fused(x_ref, w1_ref, b1_ref, w2_ref, b2_ref, g_ref, beta_ref,
                      o_ref, *, e_real, eps):
    """Grid = (row_tiles,). Full F resident: no scratch, no pl.when."""
    x = x_ref[...]
    h = jnp.dot(x.astype(w1_ref.dtype), w1_ref[...],
                preferred_element_type=jnp.float32)
    h = jnp.maximum(h + b1_ref[...], 0.0).astype(w2_ref.dtype)   # bias+ReLU+downcast
    y = jnp.dot(h, w2_ref[...], preferred_element_type=jnp.float32)
    y = y + b2_ref[...] + x.astype(jnp.float32)                  # bias + residual
    # TODO(synk): dropout is a no-op in eval mode; not applied here.
    o_ref[...] = _layer_norm(y, g_ref[...], beta_ref[...], e_real, eps).astype(o_ref.dtype)


def _ffn_kernel_acc(x_ref, w1_ref, b1_ref, w2_ref, b2_ref, g_ref, beta_ref,
                    o_ref, acc_ref, *, e_real, eps):
    """Grid = (row_tiles, f_tiles). Accumulates partial W2 products over F."""
    k = pl.program_id(1)
    nk = pl.num_programs(1)

    @pl.when(k == 0)
    def _init():
        acc_ref[...] = jnp.zeros_like(acc_ref)

    x = x_ref[...]                                               # resident over k
    h = jnp.dot(x.astype(w1_ref.dtype), w1_ref[...],
                preferred_element_type=jnp.float32)
    h = jnp.maximum(h + b1_ref[...], 0.0).astype(w2_ref.dtype)
    acc_ref[...] += jnp.dot(h, w2_ref[...], preferred_element_type=jnp.float32)

    @pl.when(k == nk - 1)
    def _finalize():
        y = acc_ref[...] + b2_ref[...] + x.astype(jnp.float32)
        o_ref[...] = _layer_norm(y, g_ref[...], beta_ref[...], e_real, eps).astype(o_ref.dtype)


def positionwise_feed_forward(x, w1, b1, w2, b2, gamma, beta, *,
                              tm=1024, tf=None, eps=1e-5,
                              matmul_dtype=jnp.bfloat16,
                              vmem_limit_bytes=None):
    """x: (B, L, E).  w1: (E, F), b1: (F,)/(1,F), w2: (F, E), b2/gamma/beta: (E,)/(1,E)."""
    B, L, E = x.shape
    F_dim = w1.shape[1]
    assert w1.shape == (E, F_dim) and w2.shape == (F_dim, E)

    if vmem_limit_bytes is None:
        vmem_limit_bytes = _default_vmem_limit()

    n_rows = B * L
    x2d = x.reshape(n_rows, E)

    # Lane-dense padding of the feature dims.
    E_pad = _round_up(E, 128)
    F_pad = _round_up(F_dim, 128)

    # Row tiling: big tile, shrunk for small inputs; keep >=2 row tiles when
    # possible so the "parallel" axis can shard across v7x's two TensorCores.
    tm_eff = max(8, min(tm, _round_up(n_rows, 8)))
    rows_pad = _round_up(n_rows, tm_eff)
    if rows_pad // tm_eff < 2 and n_rows > 8:
        tm_eff = _round_up((rows_pad + 1) // 2, 8)
        rows_pad = _round_up(n_rows, tm_eff)

    mm_item = jnp.dtype(matmul_dtype).itemsize
    x_item = jnp.dtype(x.dtype).itemsize
    out_item = x_item

    # F tiling: collapse (weights resident, DMA'd once) when the footprint fits
    # the VMEM budget; otherwise shrink tf, then tm, until it does.
    budget = int(0.6 * vmem_limit_bytes)
    tf_eff = F_pad if tf is None else min(_round_up(tf, 128), F_pad)
    while True:
        nk = pl.cdiv(F_pad, tf_eff)
        fp = _vmem_footprint(tm_eff, tf_eff, nk, E_pad, x_item, out_item, mm_item)
        if fp <= budget or (tf_eff <= 128 and tm_eff <= 8):
            break
        if tf_eff > 128:
            tf_eff = _round_up(tf_eff // 2, 128)
        else:
            tm_eff = max(8, _round_up(tm_eff // 2, 8))
            rows_pad = _round_up(n_rows, tm_eff)
    F_pad = _round_up(F_pad, tf_eff)
    nk = F_pad // tf_eff
    n_row_tiles = rows_pad // tm_eff

    f32 = jnp.float32
    # x padded in its ORIGINAL dtype (no forced f32 stream); cast in-kernel.
    xp = jnp.pad(x2d, ((0, rows_pad - n_rows), (0, E_pad - E)))
    w1p = jnp.pad(w1.astype(matmul_dtype), ((0, E_pad - E), (0, F_pad - F_dim)))
    b1p = jnp.pad(b1.reshape(1, -1).astype(f32), ((0, 0), (0, F_pad - F_dim)))
    w2p = jnp.pad(w2.astype(matmul_dtype), ((0, F_pad - F_dim), (0, E_pad - E)))
    b2p = jnp.pad(b2.reshape(1, -1).astype(f32), ((0, 0), (0, E_pad - E)))
    gp = jnp.pad(gamma.reshape(1, -1).astype(f32), ((0, 0), (0, E_pad - E)))
    bp = jnp.pad(beta.reshape(1, -1).astype(f32), ((0, 0), (0, E_pad - E)))

    weight_bytes = w1p.size * mm_item + w2p.size * mm_item
    cost = pl.CostEstimate(
        flops=int(4 * rows_pad * E_pad * F_pad),
        transcendentals=int(rows_pad),
        bytes_accessed=int(xp.size * x_item + rows_pad * E_pad * out_item
                           + weight_bytes * (1 if nk == 1 else n_row_tiles)),
    )

    if nk == 1:
        # Collapsed F axis: weights have constant block indices -> fetched once.
        kernel = functools.partial(_ffn_kernel_fused, e_real=E, eps=eps)
        grid_spec = pltpu.PrefetchScalarGridSpec(
            num_scalar_prefetch=0,
            grid=(n_row_tiles,),
            in_specs=[
                pl.BlockSpec((tm_eff, E_pad), lambda i: (i, 0)),   # x rows
                pl.BlockSpec((E_pad, F_pad), lambda i: (0, 0)),    # W1 (resident)
                pl.BlockSpec((1, F_pad), lambda i: (0, 0)),        # b1
                pl.BlockSpec((F_pad, E_pad), lambda i: (0, 0)),    # W2 (resident)
                pl.BlockSpec((1, E_pad), lambda i: (0, 0)),        # b2
                pl.BlockSpec((1, E_pad), lambda i: (0, 0)),        # LN gamma
                pl.BlockSpec((1, E_pad), lambda i: (0, 0)),        # LN beta
            ],
            out_specs=pl.BlockSpec((tm_eff, E_pad), lambda i: (i, 0)),
        )
        dim_sem = ("parallel",)
    else:
        # Tiled F axis with f32 accumulator scratch (large-F fallback).
        kernel = functools.partial(_ffn_kernel_acc, e_real=E, eps=eps)
        grid_spec = pltpu.PrefetchScalarGridSpec(
            num_scalar_prefetch=0,
            grid=(n_row_tiles, nk),
            in_specs=[
                pl.BlockSpec((tm_eff, E_pad), lambda i, k: (i, 0)),   # x (resident over k)
                pl.BlockSpec((E_pad, tf_eff), lambda i, k: (0, k)),   # W1 column chunk
                pl.BlockSpec((1, tf_eff), lambda i, k: (0, k)),       # b1 chunk
                pl.BlockSpec((tf_eff, E_pad), lambda i, k: (k, 0)),   # W2 row chunk
                pl.BlockSpec((1, E_pad), lambda i, k: (0, 0)),        # b2
                pl.BlockSpec((1, E_pad), lambda i, k: (0, 0)),        # LN gamma
                pl.BlockSpec((1, E_pad), lambda i, k: (0, 0)),        # LN beta
            ],
            out_specs=pl.BlockSpec((tm_eff, E_pad), lambda i, k: (i, 0)),
            scratch_shapes=[pltpu.VMEM((tm_eff, E_pad), jnp.float32)],
        )
        dim_sem = ("parallel", "arbitrary")

    out2d = pl.pallas_call(
        kernel,
        out_shape=jax.ShapeDtypeStruct((rows_pad, E_pad), x.dtype),
        grid_spec=grid_spec,
        compiler_params=pltpu.CompilerParams(
            dimension_semantics=dim_sem,
            vmem_limit_bytes=int(vmem_limit_bytes),
        ),
        cost_estimate=cost,
    )(xp, w1p, b1p, w2p, b2p, gp, bp)

    return out2d[:n_rows, :E].reshape(B, L, E)


if __name__ == "__main__":
    # Small shapes consistent with the module: batch=2, seq=8, emb=32, fnn=64
    B, L, E, F_dim = 2, 8, 32, 64

    key = jax.random.PRNGKey(0)
    kx, k1, kb1, k2, kb2 = jax.random.split(key, 5)

    x = jax.random.normal(kx, (B, L, E), dtype=jnp.float32)

    # Conv1d(E, F, 1) weight in PyTorch is (F, E, 1); we store the transposed
    # 2-D matmul form (E, F).  Deterministic synthetic init.
    w1 = jax.random.normal(k1, (E, F_dim), dtype=jnp.float32) * 0.05
    b1 = jax.random.normal(kb1, (1, F_dim), dtype=jnp.float32) * 0.01
    w2 = jax.random.normal(k2, (F_dim, E), dtype=jnp.float32) * 0.05
    b2 = jax.random.normal(kb2, (1, E), dtype=jnp.float32) * 0.01
    gamma = jnp.ones((1, E), dtype=jnp.float32)   # LayerNorm default init
    beta = jnp.zeros((1, E), dtype=jnp.float32)

    out = positionwise_feed_forward(x, w1, b1, w2, b2, gamma, beta)
    out = jax.block_until_ready(out)

    # Pure-JAX f32 reference check (same math, no Pallas).
    h_ref = jnp.maximum(x @ w1 + b1[0], 0.0)
    y_ref = h_ref @ w2 + b2[0] + x
    mu = y_ref.mean(-1, keepdims=True)
    var = ((y_ref - mu) ** 2).mean(-1, keepdims=True)
    ref = (y_ref - mu) / jnp.sqrt(var + 1e-5) * gamma[0] + beta[0]
    # Tolerance relaxed vs pure-f32 because matmul operands are bf16 (f32 accumulate).
    assert jnp.allclose(out, ref, atol=3e-2, rtol=3e-2), "mismatch vs reference"

    print("KERNEL_OK")
</pallas_src>

<mosaic_0001>
module attributes {stable_mosaic.version = 11 : i64} {
  func.func @_ffn_kernel_fused(%arg0: i32, %arg1: memref<8x128xf32, #tpu.memory_space<vmem>>, %arg2: memref<128x128xbf16, #tpu.memory_space<vmem>>, %arg3: memref<1x128xf32, #tpu.memory_space<vmem>>, %arg4: memref<128x128xbf16, #tpu.memory_space<vmem>>, %arg5: memref<1x128xf32, #tpu.memory_space<vmem>>, %arg6: memref<1x128xf32, #tpu.memory_space<vmem>>, %arg7: memref<1x128xf32, #tpu.memory_space<vmem>>, %arg8: memref<8x128xf32, #tpu.memory_space<vmem>>) attributes {dimension_semantics = [#tpu.dimension_semantics<parallel>], iteration_bounds = array<i64: 2>, scalar_prefetch = 0 : i64, scratch_operands = 0 : i64, tpu.core_type = #tpu.core_type<tc>, window_params = [{transform_indices = @transform_0, window_bounds = array<i64: 8, 128>}, {pipeline_mode = #tpu.pipeline_mode<synchronous>, transform_indices = @transform_1, window_bounds = array<i64: 128, 128>}, {pipeline_mode = #tpu.pipeline_mode<synchronous>, transform_indices = @transform_2, window_bounds = array<i64: 1, 128>}, {pipeline_mode = #tpu.pipeline_mode<synchronous>, transform_indices = @transform_3, window_bounds = array<i64: 128, 128>}, {pipeline_mode = #tpu.pipeline_mode<synchronous>, transform_indices = @transform_4, window_bounds = array<i64: 1, 128>}, {pipeline_mode = #tpu.pipeline_mode<synchronous>, transform_indices = @transform_5, window_bounds = array<i64: 1, 128>}, {pipeline_mode = #tpu.pipeline_mode<synchronous>, transform_indices = @transform_6, window_bounds = array<i64: 1, 128>}, {transform_indices = @transform_7, window_bounds = array<i64: 8, 128>}]} {
    %c0 = arith.constant 0 : index
    %c0_0 = arith.constant 0 : index
    %0 = vector.load %arg1[%c0, %c0_0] : memref<8x128xf32, #tpu.memory_space<vmem>>, vector<8x128xf32>
    %1 = arith.truncf %0 : vector<8x128xf32> to vector<8x128xbf16>
    %c0_1 = arith.constant 0 : index
    %c0_2 = arith.constant 0 : index
    %2 = vector.load %arg2[%c0_1, %c0_2] : memref<128x128xbf16, #tpu.memory_space<vmem>>, vector<128x128xbf16>
    %cst = arith.constant dense<0.000000e+00> : vector<8x128xf32>
    %3 = tpu.matmul %1, %2, %cst {dimension_numbers = #tpu.dot_dimension_numbers<[1], [0], [0], [1], [0, 0, 1, 1], [], []>} : vector<8x128xbf16>, vector<128x128xbf16>, vector<8x128xf32> -> vector<8x128xf32>
    %c0_3 = arith.constant 0 : index
    %c0_4 = arith.constant 0 : index
    %4 = vector.load %arg3[%c0_3, %c0_4] : memref<1x128xf32, #tpu.memory_space<vmem>>, vector<1x128xf32>
    %5 = vector.broadcast %4 : vector<1x128xf32> to vector<8x128xf32>
    %6 = arith.addf %3, %5 : vector<8x128xf32>
    %cst_5 = arith.constant 0.000000e+00 : f32
    %7 = vector.broadcast %cst_5 : f32 to vector<8x128xf32>
    %8 = arith.maximumf %6, %7 : vector<8x128xf32>
    %9 = arith.truncf %8 : vector<8x128xf32> to vector<8x128xbf16>
    %c0_6 = arith.constant 0 : index
    %c0_7 = arith.constant 0 : index
    %10 = vector.load %arg4[%c0_6, %c0_7] : memref<128x128xbf16, #tpu.memory_space<vmem>>, vector<128x128xbf16>
    %cst_8 = arith.constant dense<0.000000e+00> : vector<8x128xf32>
    %11 = tpu.matmul %9, %10, %cst_8 {dimension_numbers = #tpu.dot_dimension_numbers<[1], [0], [0], [1], [0, 0, 1, 1], [], []>} : vector<8x128xbf16>, vector<128x128xbf16>, vector<8x128xf32> -> vector<8x128xf32>
    %c0_9 = arith.constant 0 : index
    %c0_10 = arith.constant 0 : index
    %12 = vector.load %arg5[%c0_9, %c0_10] : memref<1x128xf32, #tpu.memory_space<vmem>>, vector<1x128xf32>
    %13 = vector.broadcast %12 : vector<1x128xf32> to vector<8x128xf32>
    %14 = arith.addf %11, %13 : vector<8x128xf32>
    %15 = arith.addf %14, %0 : vector<8x128xf32>
    %c0_11 = arith.constant 0 : index
    %c0_12 = arith.constant 0 : index
    %16 = vector.load %arg6[%c0_11, %c0_12] : memref<1x128xf32, #tpu.memory_space<vmem>>, vector<1x128xf32>
    %c0_13 = arith.constant 0 : index
    %c0_14 = arith.constant 0 : index
    %17 = vector.load %arg7[%c0_13, %c0_14] : memref<1x128xf32, #tpu.memory_space<vmem>>, vector<1x128xf32>
    %cst_15 = arith.constant dense<0.000000e+00> : vector<8xf32>
    %18 = vector.multi_reduction <add>, %15, %cst_15 [1] : vector<8x128xf32> to vector<8xf32>
    %19 = vector.shape_cast %18 : vector<8xf32> to vector<8x1xf32>
    %20 = arith.mulf %15, %15 : vector<8x128xf32>
    %cst_16 = arith.constant dense<0.000000e+00> : vector<8xf32>
    %21 = vector.multi_reduction <add>, %20, %cst_16 [1] : vector<8x128xf32> to vector<8xf32>
    %22 = vector.shape_cast %21 : vector<8xf32> to vector<8x1xf32>
    %cst_17 = arith.constant 3.125000e-02 : f32
    %23 = vector.broadcast %cst_17 : f32 to vector<8x1xf32>
    %24 = arith.mulf %19, %23 : vector<8x1xf32>
    %cst_18 = arith.constant 3.125000e-02 : f32
    %25 = vector.broadcast %cst_18 : f32 to vector<8x1xf32>
    %26 = arith.mulf %22, %25 : vector<8x1xf32>
    %27 = arith.mulf %24, %24 : vector<8x1xf32>
    %28 = arith.subf %26, %27 : vector<8x1xf32>
    %cst_19 = arith.constant 0.000000e+00 : f32
    %29 = vector.broadcast %cst_19 : f32 to vector<8x1xf32>
    %30 = arith.maximumf %28, %29 : vector<8x1xf32>
    %cst_20 = arith.constant 9.99999974E-6 : f32
    %31 = vector.broadcast %cst_20 : f32 to vector<8x1xf32>
    %32 = arith.addf %30, %31 : vector<8x1xf32>
    %33 = math.rsqrt %32 : vector<8x1xf32>
    %34 = vector.broadcast %24 : vector<8x1xf32> to vector<8x128xf32>
    %35 = arith.subf %15, %34 : vector<8x128xf32>
    %36 = vector.broadcast %33 : vector<8x1xf32> to vector<8x128xf32>
    %37 = arith.mulf %35, %36 : vector<8x128xf32>
    %38 = vector.broadcast %16 : vector<1x128xf32> to vector<8x128xf32>
    %39 = arith.mulf %37, %38 : vector<8x128xf32>
    %40 = vector.broadcast %17 : vector<1x128xf32> to vector<8x128xf32>
    %41 = arith.addf %39, %40 : vector<8x128xf32>
    %c0_21 = arith.constant 0 : index
    %c0_22 = arith.constant 0 : index
    %42 = vector.load %arg8[%c0_21, %c0_22] : memref<8x128xf32, #tpu.memory_space<vmem>>, vector<8x128xf32>
    tpu.vector_store %arg8[%c0_21, %c0_22], %41 {strides = array<i32>} : memref<8x128xf32, #tpu.memory_space<vmem>>, vector<8x128xf32>,
    return
  }
  func.func @transform_0(%arg0: i32) -> (i32, i32) {
    %c0_i32 = arith.constant 0 : i32
    %c0_i32_0 = arith.constant 0 : i32
    return %arg0, %c0_i32 : i32, i32
  }
  func.func @transform_1(%arg0: i32) -> (i32, i32) {
    %c0_i32 = arith.constant 0 : i32
    %c0_i32_0 = arith.constant 0 : i32
    %c0_i32_1 = arith.constant 0 : i32
    return %c0_i32, %c0_i32_0 : i32, i32
  }
  func.func @transform_2(%arg0: i32) -> (i32, i32) {
    %c0_i32 = arith.constant 0 : i32
    %c0_i32_0 = arith.constant 0 : i32
    %c0_i32_1 = arith.constant 0 : i32
    return %c0_i32, %c0_i32_0 : i32, i32
  }
  func.func @transform_3(%arg0: i32) -> (i32, i32) {
    %c0_i32 = arith.constant 0 : i32
    %c0_i32_0 = arith.constant 0 : i32
    %c0_i32_1 = arith.constant 0 : i32
    return %c0_i32, %c0_i32_0 : i32, i32
  }
  func.func @transform_4(%arg0: i32) -> (i32, i32) {
    %c0_i32 = arith.constant 0 : i32
    %c0_i32_0 = arith.constant 0 : i32
    %c0_i32_1 = arith.constant 0 : i32
    return %c0_i32, %c0_i32_0 : i32, i32
  }
  func.func @transform_5(%arg0: i32) -> (i32, i32) {
    %c0_i32 = arith.constant 0 : i32
    %c0_i32_0 = arith.constant 0 : i32
    %c0_i32_1 = arith.constant 0 : i32
    return %c0_i32, %c0_i32_0 : i32, i32
  }
  func.func @transform_6(%arg0: i32) -> (i32, i32) {
    %c0_i32 = arith.constant 0 : i32
    %c0_i32_0 = arith.constant 0 : i32
    %c0_i32_1 = arith.constant 0 : i32
    return %c0_i32, %c0_i32_0 : i32, i32
  }
  func.func @transform_7(%arg0: i32) -> (i32, i32) {
    %c0_i32 = arith.constant 0 : i32
    %c0_i32_0 = arith.constant 0 : i32
    return %arg0, %c0_i32 : i32, i32
  }
}

</mosaic_0001>

<bundles_post_ra>
// kernel: tpu_custom_call.1
= control target key start
LH: loop header
LB: loop body
LE: loop exit
PB: predicated region body
PF: predicated region fallthrough
CT: control target
= control target key end

     0   :  { %s1250_s0 = inlined_call_operand.hbm [shape: f32[16,128], index: 0, kind: input, shape index: {}]   ;;  %s1251_s1 = inlined_call_operand.hbm [shape: bf16[128,128], index: 1, kind: input, shape index: {}]   ;;  %s1252_s2 = inlined_call_operand.vmem [shape: f32[1,128], index: 2, kind: input, shape index: {}]   ;;  %s1253_s3 = inlined_call_operand.hbm [shape: bf16[128,128], index: 3, kind: input, shape index: {}]   ;;  %s1254_s4 = inlined_call_operand.vmem [shape: f32[1,128], index: 4, kind: input, shape index: {}]   ;;  %s1255_s5 = inlined_call_operand.vmem [shape: f32[1,128], index: 5, kind: input, shape index: {}]   ;;  %s1256_s6 = inlined_call_operand.vmem [shape: f32[1,128], index: 6, kind: input, shape index: {}]   ;;  %s1257_s7 = inlined_call_operand.hbm [shape: f32[16,128], index: 7, kind: output, shape index: {}]  }
   0x1   :  { %1262 = sst [smem:[#allocation12_spill]] %s1251_s1 }
   0x2   :  { %1263 = sst [smem:[#allocation13_spill]] %s1253_s3 }
   0x3   :  { %12 = vsyncpa [#allocation3], 0 }
   0x4   :  { %14 = vsyncpa [#allocation3 + $0x1], 0 }
   0x5   :  { %15 = vsyncpa [#allocation6], 0 }
   0x6   :  { %16 = vsyncpa [#allocation4], 0 }
   0x7   :  { %18 = vsyncpa [#allocation4 + $0x1], 0  ;;  %s1066_s24 = smov 0   ;;  %s1068_s25 = smov 0  }
   0x8   :  { %s1070_s26 = smov 0   ;;  %s1072_s27 = smov 0  }
   0x9 LB: > { %s1087_s28 = sadd.s32 4294967295, %s1016_s27   ;;  %s685_s29 = sadd.s32 4294967294, %s1016_s27   ;;  %s1016_s27 = sphi %s1072_s27, %s1283_s27   ;;  %s1012_s26 = sphi %s1070_s26, %s1282_s26   ;;  %s1008_s25 = sphi %s1068_s25, %s1281_s25   ;;  %s1004_s24 = sphi %s1066_s24, %s1280_s24  }
   0xa   : > { %p44_p0 = scmp.ne.s32.totalorder %s1008_s25, %s1004_s24  ;;  %p1258_p1 = scmp.eq.s32.totalorder %s1087_s28, 0 }
   0xb   : > { %p200_p3 = scmp.eq.s32.totalorder %s685_s29, 1  ;;  %p686_p5 = scmp.ge.s32.totalorder %s1016_s27, 1 }
   0xc   : > { %p1096_p4 = por %p1258_p1, %p44_p0  ;;  %p207_p7 = scmp.lt.s32.totalorder %s1016_s27, 3 }
   0xd   : > { %p1101_p6 = por %p200_p3, %p44_p0  ;;  %s1018_s10 = smov [#allocation5]  }
   0xe   : > { %s1264_s30 = scalar_select %p1096_p4, 1, 0 }
   0xf   : > { %s1265_s8 = scalar_select %p1101_p6, 1, 0 }
  0x10   : > { %p1106_p8 = pnand %p686_p5, %p207_p7  ;;  %s219_s11 = sshll.u32 %s1018_s10, 4  ;;  %s220_s11 = int_to_ptr.vmem [resolvable:$true] %s219_s11 }
  0x11   : > { %s1019_s13 = smov [#allocation7]   ;;  %s879_s15 = scalar_lea.vmem %s220_s11, 1024 }
  0x12   : > { %s1266_s9 = scalar_select %p1106_p8, 1, 0 }
  0x13   : > { %p791_p9 = pneg %p1106_p8  ;;  %s235_s14 = sshll.u32 %s1019_s13, 4  ;;  %s236_s14 = int_to_ptr.vmem [resolvable:$true] %s235_s14 }
  0x14   : > { %p880_p13 = scmp.ne.s32.totalorder %s220_s11, %s879_s15  ;;  %p887_p5 = scmp.lt.s32.totalorder %s220_s11, %s220_s11 }
  0x15   : > { %p1115_p11 = pnand %p791_p9, %p1258_p1  ;;  %p888_p7 = scmp.lt.s32.totalorder %s879_s15, %s879_s15 }
  0x17   : > { %p870_p12 = pneg %p1115_p11  ;;  %p889_p10 = por %p888_p7, %p887_p5 }
  0x19   : > { %p882_p0 = pnand %p880_p13, %p870_p12 }
  0x1b   : > { %p883_p3 = pneg %p882_p0 }
  0x1d   : > { %p890_p9 = pnand %p889_p10, %p883_p3 }
  0x1f   : > { %893 = shalt.err (!%p890_p9)
}
  0x20   : > { %s1020_s16 = smov 64   ;;  %s1021_s17 = smov 4  }
  0x21   : > { %s1268_s1 = sld [smem:[#allocation12_spill]]  ;;  %s905_s20 = scalar_lea.vmem %s236_s14, 1024 }
  0x22   : > { %p906_p1 = scmp.ne.s32.totalorder %s236_s14, %s905_s20  ;;  %p913_p2 = scmp.lt.s32.totalorder %s236_s14, %s236_s14 }
  0x23   : > { %p914_p6 = scmp.lt.s32.totalorder %s905_s20, %s905_s20 }
  0x24   : > { %p908_p13 = pnand %p906_p1, %p870_p12 }
  0x25   : > { %p915_p5 = por %p914_p6, %p913_p2 }
  0x26   : > { %p909_p0 = pneg %p908_p13 }
  0x27   : > { %794 = dma.hbm_to_vmem [thread:$0]  (!%p1115_p11), %s1268_s1, 1024, %s220_s11, [#allocation6], %s1020_s16, %s1020_s16, %s1021_s17  }
  0x28   : > { %p916_p10 = pnand %p915_p5, %p909_p0 }
  0x2a   : > { %919 = shalt.err (!%p916_p10)
}
  0x2b   : > { %s1269_s3 = sld [smem:[#allocation13_spill]]  ;;  %s1138_s23 = sadd.s32 1, %s1016_s27  }
  0x2c   : > { %s31_s29 = sadd.s32 1, %s1012_s26  ;;  %s28_s10 = ssub.s32 %s1016_s27, %s1138_s23 }
  0x2d   : > { %p38_p1 = scmp.ne.s32.totalorder %s1012_s26, %s1008_s25  ;;  %p29_p2 = scmp.eq.s32.totalorder %s28_s10, 0 }
  0x2e   : > { %p39_p6 = scmp.eq.s32.totalorder %s1016_s27, 0  ;;  %p1270_p12 = scmp.eq.s32.totalorder %s1087_s28, 1 }
  0x2f   : > { %p808_p7 = scmp.lt.s32.totalorder %s1016_s27, 2  ;;  %s258_s13 = sand.u32 1, %s1012_s26  }
  0x30   : > { %p1148_p3 = por %p1270_p12, %p38_p1  ;;  %p40_p9 = por %p39_p6, %p38_p1 }
  0x31   : > { %797 = dma.hbm_to_vmem [thread:$0]  (!%p1115_p11), %s1269_s3, 1024, %s236_s14, [#allocation6], %s1020_s16, %s1020_s16, %s1021_s17  }
  0x32   : > { %s1271_s11 = scalar_select %p1148_p3, 1, 0 }
  0x33   : > { %s1154_s12 = scalar_select %p29_p2, %s1012_s26, %s31_s29  }
  0x34   : > { %s690_s15 = sshll.u32 %s258_s13, 3  ;;  %s691_s14 = sshll.u32 %s1016_s27, 7 }
  0x35   : > { %s1161_s18 = scalar_lea.hbm %s1250_s0, %s691_s14  ;;  %s262_s19 = scalar_lea.vmem [#allocation2], %s690_s15 }
  0x36   : > { %s269_s20 = sshll.u32 %s262_s19, 4  ;;  %p1163_p11 = pnand %p808_p7, %p40_p9  ;;  %s270_s20 = int_to_ptr.vmem [resolvable:$true] %s269_s20 }
  0x37   : > { %s259_s22 = scalar_lea.sflag [#allocation3], %s258_s13  ;;  %s920_s29 = scalar_lea.hbm %s1161_s18, 128 }
  0x38   : > { %p921_p13 = scmp.ne.s32.totalorder %s1161_s18, %s920_s29  ;;  %p922_p0 = pneg %p1163_p11 }
  0x39   : > { %s925_s16 = scalar_lea.hbm %s1250_s0, 256  ;;  %p926_p1 = scmp.lt.s32.totalorder %s1161_s18, %s1250_s0 }
  0x3a   : > { %p923_p5 = pnand %p922_p0, %p921_p13  ;;  %p927_p2 = scmp.lt.s32.totalorder %s925_s16, %s920_s29 }
  0x3c   : > { %p924_p10 = pneg %p923_p5  ;;  %p928_p6 = por %p927_p2, %p926_p1 }
  0x3e   : > { %p929_p12 = pnand %p928_p6, %p924_p10 }
  0x40   : > { %932 = shalt.err (!%p929_p12)
}
  0x41   : > { %s933_s19 = scalar_lea.vmem %s270_s20, 128  ;;  %s1022_s13 = smov [#allocation2]  }
  0x42   : > { %p934_p7 = scmp.ne.s32.totalorder %s270_s20, %s933_s19  ;;  %s938_s1 = sshll.u32 %s1022_s13, 4  ;;  %s939_s1 = int_to_ptr.vmem [resolvable:$false] %s938_s1 }
  0x43   : > { %s940_s3 = scalar_lea.vmem %s939_s1, 256  ;;  %p941_p13 = scmp.lt.s32.totalorder %s270_s20, %s939_s1 }
  0x44   : > { %p936_p9 = pnand %p934_p7, %p922_p0  ;;  %p942_p5 = scmp.lt.s32.totalorder %s940_s3, %s933_s19 }
  0x46   : > { %p937_p3 = pneg %p936_p9  ;;  %p943_p4 = por %p942_p5, %p941_p13 }
  0x48   : > { %p944_p8 = pnand %p943_p4, %p937_p3 }
  0x4a   : > { %947 = shalt.err (!%p944_p8)
}
  0x4b   : > { %801 = dma.hbm_to_vmem [thread:$0]  (!%p1163_p11), %s1161_s18, 128, %s270_s20, %s259_s22  }
  0x4c   : > { %p1273_p10 = scmp.ne.s32.totalorder %s1266_s9, 0 }
  0x4d   : > { %s1184_s29 = sand.u32 (!%p1273_p10), 1, %s1008_s25   ;;  %p1274_p4 = scmp.ne.s32.totalorder (!%p1273_p10), %s1264_s30, 0 }
  0x4e   : > { %278 = sbr.rel (%p1273_p10) target bundleno = 700 (0x2bc), region = 48  ;;  %s693_s10 = sshll.u32 (!%p1273_p10), %s1184_s29, 3 }
  0x4f   : > { %s281_s1 = scalar_lea.sflag (!%p1273_p10), [#allocation3], %s1184_s29  ;;  %s1190_s3 = scalar_lea.vmem (!%p1273_p10), [#allocation2], %s693_s10 }
  0x53   : > { %991 = dma.done.wait (%p1274_p4), %s281_s1, 128  }
  0x54   : > { %993 = vsyncadd (%p1274_p4), %s281_s1, 4294967168  ;;  %p1275_p8 = scmp.eq.s32.totalorder %s1087_s28, 0 }
  0x56   : > { %995 = dma.done.wait (%p1275_p8), [#allocation6], 2048   ;;  %p1276_p3 = pmov %p1275_p8 }
  0x57   : > { %v1023_v0 = vmov 0.0   ;;  %vm1024_vm0 = vmmov 0   ;;  %v850_v1 = vld [vmem:[#allocation5 + $0x38] sm:$0xff]   ;;  %v851_v2 = vld [vmem:[#allocation5 + $0x30] sm:$0xff]   ;;  %v852_v3 = vld [vmem:[#allocation5 + $0x28] sm:$0xff]   ;;  %s718_s17 = sshll.u32 %s1087_s28, 7 }
  0x58   : > { %997 = vsyncadd (%p1276_p3), [#allocation6], 4294965248  ;;  %739 = vmatprep.subr.bf16.mxu0 %v1023_v0  ;;  %755 = vmatprep.mubr.msk.bf16.mxu0 %vm1024_vm0, %v1023_v0  ;;  %v858_v4 = vld [vmem:[#allocation7 + $0x38] sm:$0xff]   ;;  %v853_v5 = vld [vmem:[#allocation5 + $0x20] sm:$0xff]   ;;  %s322_s15 = scalar_lea.vmem [#allocation8], %s693_s10  ;;  %s583_s30 = scalar_lea.sflag [#allocation4], %s1184_s29 }
  0x59   : > { %759 = vmatprep.subr.bf16.mxu1 %v1023_v0  ;;  %775 = vmatprep.mubr.msk.bf16.mxu1 %vm1024_vm0, %v1023_v0  ;;  %v859_v6 = vld [vmem:[#allocation7 + $0x30] sm:$0xff]   ;;  %v854_v7 = vld [vmem:[#allocation5 + $0x18] sm:$0xff]   ;;  %v860_v8 = vld [vmem:[#allocation7 + $0x28] sm:$0xff]   ;;  %s596_s19 = sshll.u32 %s322_s15, 4  ;;  %p1277_p0 = scmp.ne.s32.totalorder %s1271_s11, 0  ;;  %s597_s19 = int_to_ptr.vmem [resolvable:$true] %s596_s19 }
  0x5a   : > { %740 = vmatpush3.bf16.msra.mxu0 %v850_v1  ;;  %760 = vmatpush3.bf16.msra.mxu1 %v858_v4  ;;  %v855_v9 = vld [vmem:[#allocation5 + $0x10] sm:$0xff]   ;;  %v861_v10 = vld [vmem:[#allocation7 + $0x20] sm:$0xff]   ;;  %v856_v11 = vld [vmem:[#allocation5 + $0x8] sm:$0xff]   ;;  %s948_s9 = scalar_lea.vmem %s597_s19, 128  ;;  %s1025_s18 = smov [#allocation8]  }
  0x5b   : > { %741 = vmatprep.subr.bf16.mxu0 %v1023_v0  ;;  %761 = vmatprep.subr.bf16.mxu1 %v1023_v0  ;;  %v862_v12 = vld [vmem:[#allocation7 + $0x18] sm:$0xff]   ;;  %v857_v13 = vld [vmem:[#allocation5] sm:$0xff]   ;;  %v863_v15 = vld [vmem:[#allocation7 + $0x10] sm:$0xff]   ;;  %p949_p11 = scmp.ne.s32.totalorder %s597_s19, %s948_s9  ;;  %s952_s20 = sshll.u32 %s1025_s18, 4  ;;  %s953_s20 = int_to_ptr.vmem [resolvable:$false] %s952_s20 }
  0x5c   : > { %v324_v14 = vld [vmem:[%s1190_s3] sm:$0xff]  ;;  %v864_v17 = vld [vmem:[#allocation7 + $0x8] sm:$0xff]   ;;  %v865_v18 = vld [vmem:[#allocation7] sm:$0xff]   ;;  %s594_s3 = scalar_lea.hbm %s1257_s7, %s718_s17  ;;  %s954_s28 = scalar_lea.vmem %s953_s20, 256 }
  0x5d   : > { %v325_v16 = vpack.c.bf16 %v324_v14, %v324_v14  ;;  %v697_v19 = vld [vmem:[%s1252_s2] ss:$0 sm:$0xff]  ;;  %p950_p1 = pnand %p949_p11, %p1277_p0  ;;  %p955_p6 = scmp.lt.s32.totalorder %s597_s19, %s953_s20 }
  0x5e   : > { %742 = vmatpush3.bf16.msra.mxu0 %v851_v2  ;;  %762 = vmatpush3.bf16.msra.mxu1 %v859_v6  ;;  %v706_v27 = vld [vmem:[%s1254_s4] ss:$0 sm:$0xff]  ;;  %p956_p12 = scmp.lt.s32.totalorder %s954_s28, %s948_s9 }
  0x5f   : > { %743 = vmatprep.subr.bf16.mxu0 %v1023_v0  ;;  %763 = vmatprep.subr.bf16.mxu1 %v1023_v0  ;;  %v715_v45 = vld [vmem:[%s1255_s5] ss:$0 sm:$0xff]  ;;  %p951_p2 = pneg %p950_p1 }
  0x60   : > { %v716_v47 = vld [vmem:[%s1256_s6] ss:$0 sm:$0xff]  ;;  %p957_p7 = por %p956_p12, %p955_p6 }
  0x62   : > { %744 = vmatpush3.bf16.msra.mxu0 %v852_v3  ;;  %764 = vmatpush3.bf16.msra.mxu1 %v860_v8  ;;  %p958_p9 = pnand %p957_p7, %p951_p2 }
  0x63   : > { %745 = vmatprep.subr.bf16.mxu0 %v1023_v0  ;;  %765 = vmatprep.subr.bf16.mxu1 %v1023_v0 }
  0x66   : > { %746 = vmatpush3.bf16.msra.mxu0 %v853_v5  ;;  %766 = vmatpush3.bf16.msra.mxu1 %v861_v10 }
  0x67   : > { %747 = vmatprep.subr.bf16.mxu0 %v1023_v0  ;;  %767 = vmatprep.subr.bf16.mxu1 %v1023_v0 }
  0x6a   : > { %748 = vmatpush3.bf16.msra.mxu0 %v854_v7  ;;  %768 = vmatpush3.bf16.msra.mxu1 %v862_v12 }
  0x6b   : > { %749 = vmatprep.subr.bf16.mxu0 %v1023_v0  ;;  %769 = vmatprep.subr.bf16.mxu1 %v1023_v0 }
  0x6e   : > { %750 = vmatpush3.bf16.msra.mxu0 %v855_v9  ;;  %770 = vmatpush3.bf16.msra.mxu1 %v863_v15 }
  0x6f   : > { %751 = vmatprep.subr.bf16.mxu0 %v1023_v0  ;;  %771 = vmatprep.subr.bf16.mxu1 %v1023_v0 }
  0x72   : > { %752 = vmatpush3.bf16.msra.mxu0 %v856_v11  ;;  %772 = vmatpush3.bf16.msra.mxu1 %v864_v17 }
  0x73   : > { %753 = vmatprep.subr.bf16.mxu0 %v1023_v0  ;;  %773 = vmatprep.subr.bf16.mxu1 %v1023_v0 }
  0x76   : > { %754 = vmatpush3.bf16.msra.mxu0 %v857_v13  ;;  %774 = vmatpush3.bf16.msra.mxu1 %v865_v18 }
  0x79   : > { %756 = vmatmul.mubr.bf16.vlgmr.msra.gmra.mxu0 %v325_v16 }
 0x139   : > { %v431_v20 = vpop.f32.mrf.mxu0 }
 0x13a   : > { %v432_v21 = vadd.f32 %v697_v19, %v431_v20 }
 0x13b   : > { %v757_v22 = vpop.f32.mrf.mxu0 }
 0x13c   : > { %v437_v23 = vmax.f32 %v432_v21, 0.0 }
 0x13d   : > { %v434_v24 = vpop.f32.mrf.mxu0 }
 0x13e   : > { %v438_v25 = vpack.c.bf16 %v437_v23, %v437_v23 }
 0x13f   : > { %v758_v26 = vpop.f32.mrf.mxu0 }
 0x140   : > { %776 = vmatmul.mubr.bf16.vlgmr.msra.gmra.mxu1 %v438_v25 }
 0x200   : > { %v544_v28 = vpop.f32.mrf.mxu1 }
 0x201   : > { %v545_v29 = vadd.f32 %v706_v27, %v544_v28 }
 0x202   : > { %v777_v30 = vpop.f32.mrf.mxu1 }
 0x203   : > { %v550_v31 = vadd.f32 %v545_v29, %v324_v14 }
 0x204   : > { %v547_v32 = vpop.f32.mrf.mxu1 }
 0x205   : > { %553 = vadd.xlane.f32.xlu0 %v550_v31  ;;  %v555_v34 = vmul.f32 %v550_v31, %v550_v31 }
 0x206   : > { %v778_v33 = vpop.f32.mrf.mxu1 }
 0x209   : > { %556 = vadd.xlane.f32.xlu0 %v555_v34 }
 0x28e   : > { %v554_v35 = vpop.xlane.xlu0 %553 }
 0x28f   : > { %v558_v36 = vmul.f32 0.03125, %v554_v35 }
 0x291   : > { %v560_v38 = vmul.f32 %v558_v36, %v558_v36  ;;  %v565_v43 = vsub.f32 %v550_v31, %v558_v36 }
 0x292   : > { %v557_v37 = vpop.xlane.xlu0 %556 }
 0x293   : > { %v559_v39 = vmul.f32 0.03125, %v557_v37 }
 0x295   : > { %v561_v40 = vsub.f32 %v559_v39, %v560_v38 }
 0x297   : > { %v562_v41 = vmax.f32 %v561_v40, 0.0 }
 0x299   : > { %v563_v42 = vadd.f32 1e-05, %v562_v41 }
 0x29b   : > { %866 = vrsqrt.f32 %v563_v42 }
 0x2a8   : > { %v867_v44 = vpop.eup %866 }
 0x2a9   : > { %v566_v46 = vmul.f32 %v867_v44, %v565_v43 }
 0x2ab   : > { %v573_v48 = vmul.f32 %v715_v45, %v566_v46 }
 0x2ad   : > { %v580_v49 = vadd.f32 %v716_v47, %v573_v48 }
 0x2af   : > { %581 = vst [vmem:[%s322_s15] sm:$0xff] %v580_v49 }
 0x2b0   : > { %961 = shalt.err (!%p958_p9)
}
 0x2b1   : > { %s962_s10 = scalar_lea.hbm %s594_s3, 128  ;;  %s966_s22 = scalar_lea.hbm %s1257_s7, 256 }
 0x2b2   : > { %p963_p13 = scmp.ne.s32.totalorder %s594_s3, %s962_s10  ;;  %p967_p4 = scmp.lt.s32.totalorder %s594_s3, %s1257_s7 }
 0x2b3   : > { %p968_p8 = scmp.lt.s32.totalorder %s966_s22, %s962_s10 }
 0x2b4   : > { %p964_p5 = pnand %p963_p13, %p1277_p0 }
 0x2b5   : > { %p969_p3 = por %p968_p8, %p967_p4 }
 0x2b6   : > { %p965_p10 = pneg %p964_p5 }
 0x2b8   : > { %p970_p11 = pnand %p969_p3, %p965_p10 }
 0x2ba   : > { %973 = shalt.err (!%p970_p11)
}
 0x2bb   : > { %789 = dma.vmem_to_hbm [thread:$0]  (%p1277_p0), %s597_s19, 128, %s594_s3, %s583_s30  }
 0x2bc PF: > { %s608_s17 = sand.u32 1, %s1004_s24   ;;  %p1278_p1 = scmp.ne.s32.totalorder %s1265_s8, 0 }
 0x2bd   : > { %p1279_p2 = scmp.ge.s32.totalorder %s1016_s27, 2  ;;  %s609_s15 = scalar_lea.sflag [#allocation4], %s608_s17 }
 0x2bf   : > { %p803_p6 = pnand %p1279_p2, %p1278_p1 }
 0x2c1   : > { %p804_p12 = pneg %p803_p6 }
 0x2c3   : > { %999 = dma.done.wait (%p804_p12), %s609_s15, 128  }
 0x2c4   : > { %1001 = vsyncadd (%p804_p12), %s609_s15, 4294967168  ;;  %p21_p7 = scmp.ge.s32.totalorder %s1138_s23, 4   ;;  %s1280_s24 = smov %s1008_s25 }
 0x2c5   : > { %s1281_s25 = smov %s1012_s26  ;;  %s1282_s26 = smov %s1154_s12 }
 0x2c6   : > { %s1283_s27 = smov %s1138_s23  ;;  %23 = sbr.rel (!%p21_p7) target bundleno = 9 (0x9), region = 101 }
 0x2cb   :  { %614 = vsyncpa [#allocation3], 1 }
 0x2cc   :  { %616 = vsyncpa [#allocation3 + $0x1], 1 }
 0x2cd   :  { %617 = vsyncpa [#allocation6], 1 }
 0x2ce   :  { %618 = vsyncpa [#allocation4], 1 }
 0x2cf   :  { %620 = vsyncpa [#allocation4 + $0x1], 1 }

</bundles_post_ra>
